<compile_context>
chip_gen: v5e
topology: v5e:2x2
jax: 0.10.0
libtpu: 0.0.40
codegen_flags: <defaults>
</compile_context>

<pallas_src>
import numpy as np
import jax
import jax.numpy as jnp
from jax.experimental import pallas as pl
from jax.experimental.pallas import tpu as pltpu


def _gfp_rows_kernel(x_ref, w_ref, out_ref):
    # Natural layout (E % 128 == 0): x_ref (TB, 1), w_ref (1, E) prescaled by 2*pi,
    # out_ref (TB, 2E). Each half-store is lane-aligned and unmasked.
    E = w_ref.shape[1]
    x_proj = x_ref[...] * w_ref[...]                  # (TB, E) f32, VPU
    out_ref[:, :E] = jnp.sin(x_proj).astype(out_ref.dtype)
    out_ref[:, E:] = jnp.cos(x_proj).astype(out_ref.dtype)


def _gfp_cols_kernel(x_ref, w_ref, out_ref):
    # Transposed layout (small E): x_ref (1, TB) lane-dense row, w_ref (E, 1)
    # prescaled column, out_ref (2E, TB) = sin rows then cos rows, batch on lanes.
    E = w_ref.shape[0]
    x_proj = w_ref[...] * x_ref[...]                  # (E, TB) f32
    out_ref[:E, :] = jnp.sin(x_proj).astype(out_ref.dtype)
    out_ref[E:, :] = jnp.cos(x_proj).astype(out_ref.dtype)


def _round_up(n, m):
    return ((n + m - 1) // m) * m


def _choose_batch_tile(B, E, out_bytes, vmem_budget=4 * 1024 * 1024):
    """Batch rows per grid step: multiple of 128, double-buffered in+out tiles
    kept well under the default-scoped VMEM limit, clamped to [128, 2048]."""
    per_row = 2 * (2 * E * out_bytes + 4)             # 2x for double buffering
    tb = vmem_budget // max(per_row, 1)
    tb = max(128, min(2048, (tb // 128) * 128))
    return min(tb, _round_up(B, 128))


def make_gaussian_fourier_projection(W, out_dtype=jnp.float32):
    """Init-time setup: folds 2*pi into the frozen W and returns apply(x),
    mapping (B,) or (B, 1) noise levels -> (B, 2E)."""
    w2pi = jnp.asarray(W, jnp.float32) * (2.0 * np.pi)
    E = int(w2pi.shape[-1])
    two_e = 2 * E
    out_bytes = jnp.dtype(out_dtype).itemsize
    rows_layout = (E % 128 == 0)                      # natural layout already lane-dense
    w_row = w2pi.reshape(1, E)
    w_col = w2pi.reshape(E, 1)
    cparams = pltpu.CompilerParams(dimension_semantics=("parallel",))

    @jax.jit
    def apply(x):
        x_flat = jnp.asarray(x, jnp.float32).reshape(-1)
        B = x_flat.shape[0]
        TB = _choose_batch_tile(B, E, out_bytes)
        B_pad = _round_up(B, TB)
        if B_pad != B:
            x_flat = jnp.pad(x_flat, (0, B_pad - B))
        grid = (B_pad // TB,)

        if rows_layout:
            out = pl.pallas_call(
                _gfp_rows_kernel,
                out_shape=jax.ShapeDtypeStruct((B_pad, two_e), out_dtype),
                grid=grid,
                in_specs=[
                    pl.BlockSpec((TB, 1), lambda i: (i, 0)),
                    pl.BlockSpec((1, E), lambda i: (0, 0)),
                ],
                out_specs=pl.BlockSpec((TB, two_e), lambda i: (i, 0)),
                compiler_params=cparams,
            )(x_flat.reshape(B_pad, 1), w_row)
            return out[:B]

        out_t = pl.pallas_call(
            _gfp_cols_kernel,
            out_shape=jax.ShapeDtypeStruct((two_e, B_pad), out_dtype),
            grid=grid,
            in_specs=[
                pl.BlockSpec((1, TB), lambda i: (0, i)),
                pl.BlockSpec((E, 1), lambda i: (0, 0)),
            ],
            out_specs=pl.BlockSpec((two_e, TB), lambda i: (0, i)),
            compiler_params=cparams,
        )(x_flat.reshape(1, B_pad), w_col)
        # Layout plumbing only (fused under jit): present (B, 2E) = [sin | cos].
        return out_t.T[:B]

    return apply


if __name__ == "__main__":
    key = jax.random.PRNGKey(0)
    k_w, k_x, k_w2, k_x2 = jax.random.split(key, 4)

    # --- Case 1: module defaults (E=32 -> transposed lane-dense path) ---------
    embedding_size = 32
    scale = 1.0
    batch = 8

    W = jax.random.normal(k_w, (embedding_size,), dtype=jnp.float32) * scale
    x = jax.random.uniform(k_x, (batch, 1), dtype=jnp.float32)

    gfp = make_gaussian_fourier_projection(W)
    out = jax.block_until_ready(gfp(x))

    x_proj = x * W[None, :] * 2.0 * np.pi
    ref = jnp.concatenate([jnp.sin(x_proj), jnp.cos(x_proj)], axis=-1)
    assert out.shape == (batch, 2 * embedding_size)
    np.testing.assert_allclose(np.asarray(out), np.asarray(ref), rtol=1e-5, atol=1e-5)

    # --- Case 2: E=128 (natural lane-dense path) with non-aligned batch -------
    E2, B2 = 128, 300
    W2 = jax.random.normal(k_w2, (E2,), dtype=jnp.float32)
    x2 = jax.random.uniform(k_x2, (B2, 1), dtype=jnp.float32)

    gfp2 = make_gaussian_fourier_projection(W2)
    out2 = jax.block_until_ready(gfp2(x2))

    xp2 = x2 * W2[None, :] * 2.0 * np.pi
    ref2 = jnp.concatenate([jnp.sin(xp2), jnp.cos(xp2)], axis=-1)
    assert out2.shape == (B2, 2 * E2)
    np.testing.assert_allclose(np.asarray(out2), np.asarray(ref2), rtol=1e-5, atol=1e-5)

    print("KERNEL_OK")
</pallas_src>

<mosaic_0001>
module attributes {stable_mosaic.version = 11 : i64} {
  func.func @_gfp_cols_kernel(%arg0: i32, %arg1: memref<1x128xf32, #tpu.memory_space<vmem>>, %arg2: memref<32x1xf32, #tpu.memory_space<vmem>>, %arg3: memref<64x128xf32, #tpu.memory_space<vmem>>) attributes {dimension_semantics = [#tpu.dimension_semantics<parallel>], iteration_bounds = array<i64: 1>, scalar_prefetch = 0 : i64, scratch_operands = 0 : i64, tpu.core_type = #tpu.core_type<tc>, window_params = [{transform_indices = @transform_0, window_bounds = array<i64: 1, 128>}, {pipeline_mode = #tpu.pipeline_mode<synchronous>, transform_indices = @transform_1, window_bounds = array<i64: 32, 1>}, {transform_indices = @transform_2, window_bounds = array<i64: 64, 128>}]} {
    %c0 = arith.constant 0 : index
    %c0_0 = arith.constant 0 : index
    %0 = vector.load %arg2[%c0, %c0_0] : memref<32x1xf32, #tpu.memory_space<vmem>>, vector<32x1xf32>
    %c0_1 = arith.constant 0 : index
    %c0_2 = arith.constant 0 : index
    %1 = vector.load %arg1[%c0_1, %c0_2] : memref<1x128xf32, #tpu.memory_space<vmem>>, vector<1x128xf32>
    %2 = vector.broadcast %0 : vector<32x1xf32> to vector<32x128xf32>
    %3 = vector.broadcast %1 : vector<1x128xf32> to vector<32x128xf32>
    %4 = arith.mulf %2, %3 : vector<32x128xf32>
    %5 = math.sin %4 : vector<32x128xf32>
    %c0_3 = arith.constant 0 : index
    %c0_4 = arith.constant 0 : index
    %6 = vector.load %arg3[%c0_3, %c0_4] : memref<64x128xf32, #tpu.memory_space<vmem>>, vector<32x128xf32>
    tpu.vector_store %arg3[%c0_3, %c0_4], %5 {strides = array<i32>} : memref<64x128xf32, #tpu.memory_space<vmem>>, vector<32x128xf32>,
    %7 = math.cos %4 : vector<32x128xf32>
    %c32 = arith.constant 32 : index
    %c0_5 = arith.constant 0 : index
    %8 = vector.load %arg3[%c32, %c0_5] : memref<64x128xf32, #tpu.memory_space<vmem>>, vector<32x128xf32>
    tpu.vector_store %arg3[%c32, %c0_5], %7 {strides = array<i32>} : memref<64x128xf32, #tpu.memory_space<vmem>>, vector<32x128xf32>,
    return
  }
  func.func @transform_0(%arg0: i32) -> (i32, i32) {
    %c0_i32 = arith.constant 0 : i32
    %c0_i32_0 = arith.constant 0 : i32
    return %c0_i32, %arg0 : i32, i32
  }
  func.func @transform_1(%arg0: i32) -> (i32, i32) {
    %c0_i32 = arith.constant 0 : i32
    %c0_i32_0 = arith.constant 0 : i32
    %c0_i32_1 = arith.constant 0 : i32
    return %c0_i32, %c0_i32_0 : i32, i32
  }
  func.func @transform_2(%arg0: i32) -> (i32, i32) {
    %c0_i32 = arith.constant 0 : i32
    %c0_i32_0 = arith.constant 0 : i32
    return %c0_i32, %arg0 : i32, i32
  }
}

</mosaic_0001>

<bundles_post_ra>
// kernel: apply.1
= control target key start
LH: loop header
LB: loop body
LE: loop exit
PB: predicated region body
PF: predicated region fallthrough
CT: control target
= control target key end

     0   :  { %7 = vsyncpa [#allocation3], 0  ;;  %s1371_s12 = smov [#allocation2]   ;;  %s1372_s14 = smov 128   ;;  %s1867_s0 = inlined_call_operand.vmem [shape: f32[1,128], index: 0, kind: input, shape index: {}]   ;;  %s1868_s1 = inlined_call_operand.hbm [shape: f32[32,1], index: 1, kind: input, shape index: {}]   ;;  %s1869_s2 = inlined_call_operand.vmem [shape: f32[64,128], index: 2, kind: output, shape index: {}]  }
   0x1   :  { %s14_s11 = sshll.u32 %s1868_s1, 4  ;;  %s16_s13 = sshll.u32 %s1371_s12, 4  ;;  %s15_s11 = int_to_ptr.hbm [resolvable:$true] %s14_s11  ;;  %s17_s13 = int_to_ptr.vmem [resolvable:$true] %s16_s13 }
   0x2   :  { %s1373_s15 = smov 8  }
   0x3   :  { %22 = dma.hbm_to_vmem [thread:$0]  %s15_s11, 512, %s17_s13, [#allocation3], %s1372_s14, %s1372_s14, %s1373_s15  }
   0x4   :  { %1369 = dma.done.wait [#allocation3], 512  }
   0x5   :  { %1370 = vsyncadd [#allocation3], 4294966784  ;;  %v1374_v0 = vmov 0   ;;  %v29_v1 = vld [vmem:[#allocation2 + $0x10] sm:$0xff]  ;;  %v27_v2 = vld [vmem:[#allocation2] sm:$0xff] }
   0x6   :  { %1343 = vset.pattern.permute.xlu1 %v1374_v0  ;;  %1342 = vset.pattern.permute.xlu0 %v1374_v0  ;;  %v30_v3 = vld [vmem:[#allocation2 + $0x18] sm:$0xff]  ;;  %v28_v4 = vld [vmem:[#allocation2 + $0x8] sm:$0xff]  ;;  %v1404_v5 = vld [vmem:[%s1867_s0] ss:$0 sm:$0xff]  ;;  %v1375_v36 = vmov 683565275  }
   0x7   :  { %44 = vperm.xlu1 %1343, %v29_v1   ;;  %34 = vperm.xlu0 %1342, %v27_v2   ;;  %v1376_v38 = vmov 2475754826   ;;  %v1377_v42 = vmov 2131351028   ;;  %v1378_v45 = vmov 2102212464  }
   0x8   :  { %v1379_v48 = vmov 920167782   ;;  %v1380_v51 = vmov 1326507024  }
   0xf   :  { %49 = vperm.xlu1 %1343, %v30_v3   ;;  %39 = vperm.xlu0 %1342, %v28_v4  }
  0x79   :  { %v45_v6 = vpop.permute.xlu1 %44  ;;  %v35_v7 = vpop.permute.xlu0 %34 }
  0x7a   :  { %v1407_v8 = vmul.f32 %v1404_v5, %v45_v6  ;;  %v1410_v9 = vmul.f32 %v1404_v5, %v35_v7 }
  0x7c   :  { %v369_v10 = vand.u32 2147483647, %v1407_v8  ;;  %v372_v11 = vand.u32 2139095040, %v1407_v8  ;;  %v59_v12 = vand.u32 2147483647, %v1410_v9  ;;  %v62_v13 = vand.u32 2139095040, %v1410_v9 }
  0x7e   :  { %v373_v14 = vshrl.u32 %v372_v11, 23  ;;  %v376_v15 = vand.u32 8388607, %v369_v10  ;;  %v63_v16 = vshrl.u32 %v62_v13, 23  ;;  %v66_v17 = vand.u32 8388607, %v59_v12 }
  0x80   :  { %v1314_v18 = vadd.s32 4294967169, %v373_v14  ;;  %v377_v19 = vor.u32 8388608, %v376_v15  ;;  %v1308_v20 = vadd.s32 4294967169, %v63_v16  ;;  %v67_v21 = vor.u32 8388608, %v66_v17 }
  0x81   :  { %v50_v25 = vpop.permute.xlu1 %49 }
  0x82   :  { %v379_v22 = vadd.s32 1, %v1314_v18  ;;  %v69_v23 = vadd.s32 1, %v1308_v20  ;;  %v1420_v24 = vshll.u32 %v377_v19, 8  ;;  %v1422_v27 = vshll.u32 %v67_v21, 8 }
  0x83   :  { %v1425_v30 = vmul.f32 %v1404_v5, %v50_v25 }
  0x84   :  { %vm380_vm0 = vcmp.gt.s32.totalorder %v379_v22, 0  ;;  %vm70_vm1 = vcmp.gt.s32.totalorder %v69_v23, 0  ;;  %v1428_v32 = vand.u32 65535, %v1420_v24  ;;  %v1431_v33 = vshrl.u32 %v1420_v24, 16 }
  0x85   :  { %v381_v26 = vsel %vm380_vm0, %v379_v22, 0  ;;  %v71_v29 = vsel %vm70_vm1, %v69_v23, 0  ;;  %v1440_v40 = vand.u32 65535, %v1422_v27 }
  0x86   :  { %v383_v28 = vand.u32 31, %v381_v26  ;;  %v1433_v34 = vand.u32 31, %v71_v29  ;;  %v1435_v35 = vshrl.u32 %v381_v26, 5  ;;  %v1482_v21 = vshrl.u32 %v71_v29, 5 }
  0x88   :  { %v384_v31 = vsub.s32 32, %v383_v28  ;;  %v386_v37 = vshll.u32 %v1375_v36, %v383_v28  ;;  %v389_v39 = vshll.u32 %v1376_v38, %v383_v28  ;;  %v392_v44 = vshll.u32 %v1377_v42, %v383_v28 }
  0x89   :  { %v395_v47 = vshll.u32 %v1378_v45, %v383_v28  ;;  %v398_v50 = vshll.u32 %v1379_v48, %v383_v28  ;;  %v1451_v56 = vsub.s32 32, %v1433_v34  ;;  %vm401_vm2 = vcmp.lt.s32.totalorder %v1435_v35, 1 }
  0x8a   :  { %v387_v41 = vshrl.u32 %v1376_v38, %v384_v31  ;;  %v390_v43 = vshrl.u32 %v1377_v42, %v384_v31  ;;  %v393_v46 = vshrl.u32 %v1378_v45, %v384_v31  ;;  %v396_v49 = vshrl.u32 %v1379_v48, %v384_v31 }
  0x8b   :  { %v399_v52 = vshrl.u32 %v1380_v51, %v384_v31  ;;  %vm402_vm3 = vcmp.lt.s32.totalorder %v1435_v35, 2  ;;  %v385_v59 = vshrl.u32 %v1375_v36, %v384_v31  ;;  %vm404_vm4 = vcmp.lt.s32.totalorder %v1435_v35, 4 }
  0x8c   :  { %v388_v53 = vor.u32 %v387_v41, %v386_v37  ;;  %v391_v54 = vor.u32 %v390_v43, %v389_v39  ;;  %v394_v55 = vor.u32 %v393_v46, %v392_v44  ;;  %v397_v57 = vor.u32 %v396_v49, %v395_v47 }
  0x8d   :  { %v400_v58 = vor.u32 %v399_v52, %v398_v50  ;;  %vm403_vm5 = vcmp.lt.s32.totalorder %v1435_v35, 3  ;;  %v76_v1 = vshll.u32 %v1375_v36, %v1433_v34  ;;  %v77_v6 = vshrl.u32 %v1376_v38, %v1451_v56 }
  0x8e   :  { %v409_v60 = vsel %vm401_vm2, %v388_v53, %v391_v54  ;;  %v413_v61 = vsel %vm401_vm2, %v391_v54, %v394_v55  ;;  %v410_v62 = vsel %vm404_vm4, %v397_v57, 920167782  ;;  %v406_v2 = vsel %vm404_vm4, %v394_v55, 2102212464 }
  0x8f   :  { %v414_v63 = vsel %vm404_vm4, %v400_v58, 1326507024  ;;  %v411_v3 = vsel %vm403_vm5, %v394_v55, %v410_v62  ;;  %v79_v13 = vshll.u32 %v1376_v38, %v1433_v34  ;;  %v80_v14 = vshrl.u32 %v1377_v42, %v1451_v56 }
  0x90   :  { %v415_v4 = vsel %vm403_vm5, %v397_v57, %v414_v63  ;;  %v412_v7 = vsel %vm402_vm3, %v409_v60, %v411_v3  ;;  %v405_v19 = vsel %vm401_vm2, %v385_v59, %v388_v53  ;;  %v407_v20 = vsel %vm403_vm5, %v391_v54, %v406_v2 }
  0x91   :  { %v416_v11 = vsel %vm402_vm3, %v413_v61, %v415_v4  ;;  %v442_v17 = vand.u32 65535, %v412_v7  ;;  %v443_v18 = vshrl.u32 %v412_v7, 16  ;;  %v1484_v22 = vor.u32 %v77_v6, %v76_v1 }
  0x92   :  { %v420_v15 = vand.u32 65535, %v416_v11  ;;  %v421_v16 = vshrl.u32 %v416_v11, 16  ;;  %v1488_v26 = vor.u32 %v80_v14, %v79_v13  ;;  %v83_v28 = vshrl.u32 %v1378_v45, %v1451_v56 }
  0x93   :  { %v445_v37 = vmul.u32 %v443_v18, %v1428_v32  ;;  %v446_v39 = vmul.u32 %v442_v17, %v1431_v33  ;;  %v82_v29 = vshll.u32 %v1377_v42, %v1433_v34  ;;  %v444_v44 = vmul.u32 %v442_v17, %v1428_v32 }
  0x94   :  { %v423_v23 = vmul.u32 %v421_v16, %v1428_v32  ;;  %v424_v25 = vmul.u32 %v420_v15, %v1431_v33  ;;  %v422_v31 = vmul.u32 %v420_v15, %v1428_v32  ;;  %v425_v41 = vmul.u32 %v421_v16, %v1431_v33 }
  0x95   :  { %v447_v46 = vmul.u32 %v443_v18, %v1431_v33  ;;  %v448_v52 = vshll.u32 %v445_v37, 16  ;;  %v450_v54 = vshll.u32 %v446_v39, 16  ;;  %v1500_v55 = vor.u32 %v83_v28, %v82_v29 }
  0x96   :  { %v426_v43 = vshll.u32 %v423_v23, 16  ;;  %v427_v47 = vshrl.u32 %v423_v23, 16  ;;  %v428_v49 = vshll.u32 %v424_v25, 16  ;;  %v429_v50 = vshrl.u32 %v424_v25, 16 }
  0x97   :  { %vm452_vm7 = vc.u32 %v444_v44, %v448_v52  ;;  %v454_v58 = vadd.s32 %v448_v52, %v444_v44  ;;  %v86_v59 = vshrl.u32 %v1379_v48, %v1451_v56  ;;  %v85_v33 = vshll.u32 %v1378_v45, %v1433_v34 }
  0x98   :  { %vm430_vm6 = vc.u32 %v422_v31, %v426_v43  ;;  %v432_v53 = vadd.s32 %v426_v43, %v422_v31  ;;  %v453_v32 = vsel %vm452_vm7, 1, %v1374_v0  ;;  %v88_v63 = vshll.u32 %v1379_v48, %v1433_v34 }
  0x99   :  { %v431_v57 = vsel %vm430_vm6, 1, %v1374_v0  ;;  %v455_v62 = vadd.s32 %v453_v32, %v447_v46  ;;  %vm456_vm9 = vc.u32 %v454_v58, %v450_v54  ;;  %v87_v3 = vor.u32 %v86_v59, %v85_v33 }
  0x9a   :  { %v433_v60 = vadd.s32 %v431_v57, %v425_v41  ;;  %vm434_vm8 = vc.u32 %v432_v53, %v428_v49  ;;  %v457_v2 = vsel %vm456_vm9, 1, %v1374_v0  ;;  %v89_v4 = vshrl.u32 %v1380_v51, %v1451_v56 }
  0x9b   :  { %v435_v61 = vsel %vm434_vm8, 1, %v1374_v0  ;;  %v449_v6 = vshrl.u32 %v445_v37, 16  ;;  %v451_v7 = vshrl.u32 %v446_v39, 16  ;;  %v1514_v11 = vadd.s32 %v454_v58, %v450_v54 }
  0x9c   :  { %v437_v1 = vadd.s32 %v435_v61, %v433_v60  ;;  %v459_v13 = vadd.s32 %v457_v2, %v455_v62  ;;  %v90_v15 = vor.u32 %v89_v4, %v88_v63  ;;  %vm91_vm10 = vcmp.lt.s32.totalorder %v1482_v21, 1 }
  0x9d   :  { %vm94_vm11 = vcmp.lt.s32.totalorder %v1482_v21, 4  ;;  %vm93_vm12 = vcmp.lt.s32.totalorder %v1482_v21, 3  ;;  %v99_v34 = vsel %vm91_vm10, %v1484_v22, %v1488_v26  ;;  %vm92_vm13 = vcmp.lt.s32.totalorder %v1482_v21, 2 }
  0x9e   :  { %v438_v14 = vadd.s32 %v437_v1, %v427_v47  ;;  %v460_v16 = vadd.s32 %v459_v13, %v449_v6  ;;  %v100_v17 = vsel %vm94_vm11, %v87_v3, 920167782  ;;  %v103_v25 = vsel %vm91_vm10, %v1488_v26, %v1500_v55 }
  0x9f   :  { %v101_v23 = vsel %vm93_vm12, %v1500_v55, %v100_v17  ;;  %v408_v28 = vsel %vm402_vm3, %v405_v19, %v407_v20  ;;  %v104_v39 = vsel %vm94_vm11, %v90_v15, 1326507024  ;;  %v109_v41 = vshrl.u32 %v1422_v27, 16 }
  0xa0   :  { %v1525_v18 = vadd.s32 %v438_v14, %v429_v50  ;;  %v461_v31 = vadd.s32 %v460_v16, %v451_v7  ;;  %v102_v37 = vsel %vm92_vm13, %v99_v34, %v101_v23  ;;  %v105_v29 = vsel %vm93_vm12, %v87_v3, %v104_v39 }
  0xa1   :  { %v132_v43 = vand.u32 65535, %v102_v37  ;;  %v106_v35 = vsel %vm92_vm13, %v103_v25, %v105_v29  ;;  %v133_v19 = vshrl.u32 %v102_v37, 16  ;;  %v527_v20 = vand.u32 2139095040, %v1425_v30 }
  0xa2   :  { %vm464_vm14 = vc.u32 %v1525_v18, %v1514_v11  ;;  %v465_v44 = vadd.s32 1, %v461_v31  ;;  %v462_v46 = vmul.u32 %v1420_v24, %v408_v28  ;;  %v110_v47 = vand.u32 65535, %v106_v35 }
  0xa3   :  { %v111_v49 = vshrl.u32 %v106_v35, 16  ;;  %v135_v52 = vmul.u32 %v133_v19, %v1440_v40  ;;  %v136_v53 = vmul.u32 %v132_v43, %v109_v41  ;;  %v134_v59 = vmul.u32 %v132_v43, %v1440_v40 }
  0xa4   :  { %v466_v50 = vsel %vm464_vm14, %v465_v44, %v461_v31  ;;  %v114_v58 = vmul.u32 %v110_v47, %v109_v41  ;;  %v137_v60 = vmul.u32 %v133_v19, %v109_v41  ;;  %v528_v33 = vshrl.u32 %v527_v20, 23 }
  0xa5   :  { %v467_v54 = vadd.s32 %v466_v50, %v462_v46  ;;  %v113_v57 = vmul.u32 %v111_v49, %v1440_v40  ;;  %v138_v32 = vshll.u32 %v135_v52, 16  ;;  %v112_v62 = vmul.u32 %v110_v47, %v1440_v40 }
  0xa6   :  { %v115_v63 = vmul.u32 %v111_v49, %v109_v41  ;;  %v118_v1 = vshll.u32 %v114_v58, 16  ;;  %v140_v2 = vshll.u32 %v136_v53, 16  ;;  %v75_v13 = vshrl.u32 %v1375_v36, %v1451_v56 }
  0xa7   :  { %v468_v61 = vadd.s32 536870912, %v467_v54  ;;  %v116_v24 = vshll.u32 %v113_v57, 16  ;;  %vm142_vm15 = vc.u32 %v134_v59, %v138_v32  ;;  %v144_v3 = vadd.s32 %v138_v32, %v134_v59 }
  0xa8   :  { %v143_v7 = vsel %vm142_vm15, 1, %v1374_v0  ;;  %v96_v40 = vsel %vm94_vm11, %v1500_v55, 2102212464  ;;  %v524_v25 = vand.u32 2147483647, %v1425_v30  ;;  %v1317_v28 = vadd.s32 4294967169, %v528_v33 }
  0xa9   :  { %v469_v4 = vshrl.u32 %v468_v61, 30  ;;  %vm120_vm0 = vc.u32 %v112_v62, %v116_v24  ;;  %v122_v6 = vadd.s32 %v116_v24, %v112_v62  ;;  %v145_v15 = vadd.s32 %v143_v7, %v137_v60 }
  0xaa   :  { %v121_v14 = vsel %vm120_vm0, 1, %v1374_v0  ;;  %vm146_vm1 = vc.u32 %v144_v3, %v140_v2  ;;  %v95_v56 = vsel %vm91_vm10, %v75_v13, %v1484_v22  ;;  %v97_v55 = vsel %vm93_vm12, %v1488_v26, %v96_v40 }
  0xab   :  { %v470_v16 = vshll.u32 %v469_v4, 30  ;;  %v123_v34 = vadd.s32 %v121_v14, %v115_v63  ;;  %vm124_vm2 = vc.u32 %v122_v6, %v118_v1  ;;  %v147_v23 = vsel %vm146_vm1, 1, %v1374_v0 }
  0xac   :  { %v125_v17 = vsel %vm124_vm2, 1, %v1374_v0  ;;  %v149_v39 = vadd.s32 %v147_v23, %v145_v15  ;;  %v117_v29 = vshrl.u32 %v113_v57, 16  ;;  %v139_v41 = vshrl.u32 %v135_v52, 16 }
  0xad   :  { %v471_v31 = vsub.s32 %v467_v54, %v470_v16  ;;  %v127_v37 = vadd.s32 %v125_v17, %v123_v34  ;;  %v534_v43 = vadd.s32 1, %v1317_v28  ;;  %v493_v35 = vsub.s32 4, %v469_v4 }
  0xae   :  { %v119_v19 = vshrl.u32 %v114_v58, 16  ;;  %v141_v46 = vshrl.u32 %v136_v53, 16  ;;  %v150_v47 = vadd.s32 %v149_v39, %v139_v41  ;;  %vm371_vm5 = vcmp.lt.s32.totalorder %v1407_v8, 0 }
  0xaf   :  { %vm472_vm3 = vcmp.lt.s32.totalorder %v471_v31, 0  ;;  %v473_v44 = vsub.s32 0, %v471_v31  ;;  %v128_v20 = vadd.s32 %v127_v37, %v117_v29  ;;  %vm535_vm4 = vcmp.gt.s32.totalorder %v534_v43, 0 }
  0xb0   :  { %v98_v49 = vsel %vm92_vm13, %v95_v56, %v97_v55  ;;  %v148_v26 = vadd.s32 %v144_v3, %v140_v2  ;;  %v151_v57 = vadd.s32 %v150_v47, %v141_v46  ;;  %v494_v52 = vsel %vm371_vm5, %v493_v35, %v469_v4 }
  0xb1   :  { %v474_v22 = vsel %vm472_vm3, %v473_v44, %v471_v31  ;;  %v129_v54 = vadd.s32 %v128_v20, %v119_v19  ;;  %v536_v59 = vsel %vm535_vm4, %v534_v43, 0  ;;  %v531_v53 = vand.u32 8388607, %v524_v25 }
  0xb2   :  { %v475_v50 = vclz %v474_v22  ;;  %v155_v58 = vadd.s32 1, %v151_v57  ;;  %vm1579_vm7 = vcmp.le.f32.partialorder %v369_v10, 0.7853982  ;;  %v152_v21 = vmul.u32 %v1422_v27, %v98_v49 }
  0xb3   :  { %vm154_vm6 = vc.u32 %v129_v54, %v148_v26  ;;  %v538_v33 = vand.u32 31, %v536_v59  ;;  %v496_v61 = vsel %vm1579_vm7, 0, %v494_v52  ;;  %v463_v63 = vadd.s32 %v1514_v11, %v1525_v18 }
  0xb4   :  { %v1315_v60 = vadd.s32 4294967294, %v475_v50  ;;  %v156_v62 = vsel %vm154_vm6, %v155_v58, %v151_v57  ;;  %v532_v4 = vor.u32 8388608, %v531_v53  ;;  %v513_v6 = vadd.s32 3, %v496_v61 }
  0xb5   :  { %v157_v1 = vadd.s32 %v156_v62, %v152_v21  ;;  %v539_v10 = vsub.s32 32, %v538_v33  ;;  %v1588_v15 = vand.u32 3, %v496_v61  ;;  %v1595_v28 = vshrl.u32 %v536_v59, 5 }
  0xb6   :  { %vm1316_vm8 = vcmp.lt.s32.totalorder %v1315_v60, 0  ;;  %v1591_v23 = vshll.u32 %v532_v4, 8  ;;  %v1593_v11 = vand.u32 3, %v513_v6  ;;  %v544_v41 = vshll.u32 %v1376_v38, %v538_v33 }
  0xb7   :  { %v478_v24 = vsel %vm1316_vm8, 0, %v1315_v60  ;;  %v158_v7 = vadd.s32 536870912, %v157_v1  ;;  %v542_v17 = vshrl.u32 %v1376_v38, %v539_v10  ;;  %v545_v56 = vshrl.u32 %v1377_v42, %v539_v10 }
  0xb8   :  { %v479_v2 = vsub.s32 32, %v478_v24  ;;  %v483_v3 = vsub.s32 4294967266, %v478_v24  ;;  %v480_v13 = vshll.u32 %v471_v31, %v478_v24  ;;  %v541_v31 = vshll.u32 %v1375_v36, %v538_v33 }
  0xb9   :  { %v159_v16 = vshrl.u32 %v158_v7, 30  ;;  %v548_v39 = vshrl.u32 %v1378_v45, %v539_v10  ;;  %v551_v55 = vshrl.u32 %v1379_v48, %v539_v10  ;;  %v547_v43 = vshll.u32 %v1377_v42, %v538_v33 }
  0xba   :  { %v481_v14 = vshrl.u32 %v463_v63, %v479_v2  ;;  %v484_v27 = vadd.s32 127, %v483_v3  ;;  %v554_v44 = vshrl.u32 %v1380_v51, %v539_v10  ;;  %vm61_vm9 = vcmp.lt.s32.totalorder %v1410_v9, 0  ;;  %v40_v3 = vpop.permute.xlu0 %39 }
  0xbb   :  { %v160_v18 = vshll.u32 %v159_v16, 30  ;;  %v543_v20 = vor.u32 %v542_v17, %v541_v31  ;;  %v550_v46 = vshll.u32 %v1378_v45, %v538_v33  ;;  %v1610_v22 = vor.u32 %v545_v56, %v544_v41 }
  0xbc   :  { %v482_v40 = vor.u32 %v481_v14, %v480_v13  ;;  %v485_v34 = vshll.u32 %v484_v27, 23  ;;  %v553_v49 = vshll.u32 %v1379_v48, %v538_v33  ;;  %v153_v57 = vadd.s32 %v148_v26, %v129_v54 }
  0xbd   :  { %v1601_v29 = vsub.s32 %v157_v1, %v160_v18  ;;  %v549_v52 = vor.u32 %v548_v39, %v547_v43  ;;  %v552_v59 = vor.u32 %v551_v55, %v550_v46  ;;  %v1615_v53 = vand.u32 65535, %v1591_v23 }
  0xbe   :  { %v486_v37 = vor.u32 4788187, %v485_v34  ;;  %v489_v19 = vcvt.s32.f32 %v482_v40  ;;  %v555_v58 = vor.u32 %v554_v44, %v553_v49  ;;  %v1618_v21 = vshrl.u32 %v1591_v23, 16 }
  0xbf   :  { %vm162_vm10 = vcmp.lt.s32.totalorder %v1601_v29, 0  ;;  %v163_v47 = vsub.s32 0, %v1601_v29  ;;  %v540_v63 = vshrl.u32 %v1375_v36, %v539_v10  ;;  %vm556_vm11 = vcmp.lt.s32.totalorder %v1595_v28, 1 }
  0xc0   :  { %v487_v35 = vand.u32 2147483647, %v486_v37  ;;  %v183_v33 = vsub.s32 4, %v159_v16  ;;  %vm558_vm12 = vcmp.lt.s32.totalorder %v1595_v28, 3  ;;  %vm559_vm13 = vcmp.lt.s32.totalorder %v1595_v28, 4 }
  0xc1   :  { %v164_v60 = vsel %vm162_vm10, %v163_v47, %v1601_v29  ;;  %v564_v54 = vsel %vm556_vm11, %v543_v20, %v1610_v22  ;;  %v565_v1 = vsel %vm559_vm13, %v552_v59, 920167782  ;;  %v568_v2 = vsel %vm556_vm11, %v1610_v22, %v549_v52 }
  0xc2   :  { %v490_v50 = vmul.f32 %v489_v19, %v487_v35  ;;  %v165_v62 = vclz %v164_v60  ;;  %vm557_vm14 = vcmp.lt.s32.totalorder %v1595_v28, 2  ;;  %v566_v10 = vsel %vm558_vm12, %v549_v52, %v565_v1 }
  0xc3   :  { %v569_v6 = vsel %vm559_vm13, %v555_v58, 1326507024  ;;  %v567_v13 = vsel %vm557_vm14, %v564_v54, %v566_v10  ;;  %v1652_v27 = vsel %vm61_vm9, %v183_v33, %v159_v16  ;;  %v1657_v34 = vmul.f32 %v1404_v5, %v40_v3 }
  0xc4   :  { %v491_v61 = vxor.u32 2147483648, %v490_v50  ;;  %v1309_v24 = vadd.s32 4294967294, %v165_v62  ;;  %v570_v32 = vsel %vm558_vm12, %v552_v59, %v569_v6  ;;  %v1661_v37 = vsel %vm556_vm11, %v540_v63, %v543_v20 }
  0xc5   :  { %v571_v40 = vsel %vm557_vm14, %v568_v2, %v570_v32  ;;  %v598_v41 = vshrl.u32 %v567_v13, 16  ;;  %v1666_v5 = vsel %vm559_vm13, %v549_v52, 2102212464  ;;  %v597_v59 = vand.u32 65535, %v567_v13 }
  0xc6   :  { %v492_v26 = vsel %vm371_vm5, %v491_v61, %v490_v50  ;;  %vm1310_vm15 = vcmp.lt.s32.totalorder %v1309_v24, 0  ;;  %v575_v39 = vand.u32 65535, %v571_v40  ;;  %v576_v55 = vshrl.u32 %v571_v40, 16 }
  0xc7   :  { %v1637_v4 = vsel %vm1579_vm7, %v1407_v8, %v492_v26  ;;  %v168_v14 = vsel %vm1310_vm15, 0, %v1309_v24  ;;  %vm519_vm0 = vcmp.eq.s32.totalorder %v1593_v11, 2  ;;  %vm1140_vm1 = vcmp.eq.s32.totalorder %v1588_v15, 2 }
  0xc8   :  { %v497_v7 = vmul.f32 %v1637_v4, %v1637_v4  ;;  %v169_v56 = vsub.s32 32, %v168_v14  ;;  %v173_v31 = vsub.s32 4294967266, %v168_v14  ;;  %v170_v44 = vshll.u32 %v1601_v29, %v168_v14 }
  0xc9   :  { %v578_v46 = vmul.u32 %v576_v55, %v1615_v53  ;;  %v1670_v47 = vmul.u32 %v575_v39, %v1618_v21  ;;  %v577_v58 = vmul.u32 %v575_v39, %v1615_v53  ;;  %v1674_v29 = vmul.u32 %v598_v41, %v1615_v53 }
  0xca   :  { %v498_v17 = vmul.f32 -0.001358992, %v497_v7  ;;  %v505_v18 = vmul.f32 -0.00019511016, %v497_v7  ;;  %v171_v35 = vshrl.u32 %v153_v57, %v169_v56  ;;  %v174_v19 = vadd.s32 127, %v173_v31 }
  0xcb   :  { %v581_v61 = vshll.u32 %v578_v46, 16  ;;  %v580_v52 = vmul.u32 %v576_v55, %v1618_v21  ;;  %v583_v63 = vshll.u32 %v1670_v47, 16  ;;  %vm516_vm2 = vcmp.eq.s32.totalorder %v1593_v11, 0 }
  0xcc   :  { %v499_v43 = vadd.f32 0.041655596, %v498_v17  ;;  %v506_v16 = vadd.f32 0.008332121, %v505_v18  ;;  %v172_v50 = vor.u32 %v171_v35, %v170_v44  ;;  %v175_v60 = vshll.u32 %v174_v19, 23 }
  0xcd   :  { %vm1137_vm3 = vcmp.eq.s32.totalorder %v1588_v15, 0  ;;  %vm1684_vm4 = vcmp.le.f32.partialorder %v59_v12, 0.7853982  ;;  %vm585_vm5 = vc.u32 %v577_v58, %v581_v61  ;;  %v587_v24 = vadd.s32 %v581_v61, %v577_v58 }
  0xce   :  { %v500_v20 = vmul.f32 %v499_v43, %v497_v7  ;;  %v507_v49 = vmul.f32 %v506_v16, %v497_v7  ;;  %v176_v54 = vor.u32 4788187, %v175_v60  ;;  %v179_v26 = vcvt.s32.f32 %v172_v50 }
  0xcf   :  { %vm515_vm6 = vcmp.lt.s32.totalorder %v1593_v11, 2  ;;  %vm1136_vm7 = vcmp.lt.s32.totalorder %v1588_v15, 2  ;;  %v586_v3 = vsel %vm585_vm5, 1, %v1374_v0  ;;  %v601_v10 = vmul.u32 %v597_v59, %v1618_v21 }
  0xd0   :  { %v501_v57 = vadd.f32 -0.4999988, %v500_v20  ;;  %v508_v62 = vadd.f32 -0.16666654, %v507_v49  ;;  %vm512_vm8 = vweird.f32 %v1407_v8  ;;  %v177_v12 = vand.u32 2147483647, %v176_v54 }
  0xd1   :  { %v588_v6 = vadd.s32 %v586_v3, %v580_v52  ;;  %vm589_vm10 = vc.u32 %v587_v24, %v583_v63  ;;  %v603_v13 = vshll.u32 %v1674_v29, 16  ;;  %v582_v18 = vshrl.u32 %v578_v46, 16 }
  0xd2   :  { %v502_v1 = vmul.f32 %v501_v57, %v497_v7  ;;  %v509_v2 = vmul.f32 %v508_v62, %v497_v7  ;;  %v590_v40 = vsel %vm589_vm10, 1, %v1374_v0  ;;  %v599_v7 = vmul.u32 %v597_v59, %v1615_v53 }
  0xd3   :  { %v180_v17 = vmul.f32 %v179_v26, %v177_v12  ;;  %v592_v56 = vadd.s32 %v590_v40, %v588_v6  ;;  %v602_v31 = vmul.u32 %v598_v41, %v1618_v21  ;;  %v584_v44 = vshrl.u32 %v1670_v47, 16 }
  0xd4   :  { %v503_v32 = vadd.f32 1.0, %v502_v1  ;;  %v510_v14 = vadd.f32 1.0, %v509_v2  ;;  %vm607_vm11 = vc.u32 %v599_v7, %v603_v13  ;;  %v609_v43 = vadd.s32 %v603_v13, %v599_v7 }
  0xd5   :  { %v181_v16 = vxor.u32 2147483648, %v180_v17  ;;  %v605_v35 = vshll.u32 %v601_v10, 16  ;;  %v608_v19 = vsel %vm607_vm11, 1, %v1374_v0  ;;  %v593_v49 = vadd.s32 %v592_v56, %v582_v18 }
  0xd6   :  { %v511_v39 = vmul.f32 %v510_v14, %v1637_v4  ;;  %v520_v55 = vxor.u32 2147483648, %v503_v32  ;;  %v604_v53 = vshrl.u32 %v1674_v29, 16  ;;  %v610_v50 = vadd.s32 %v608_v19, %v602_v31 }
  0xd7   :  { %v182_v4 = vsel %vm61_vm9, %v181_v16, %v180_v17  ;;  %vm611_vm13 = vc.u32 %v609_v43, %v605_v35  ;;  %v562_v63 = vsel %vm558_vm12, %v1610_v22, %v1666_v5  ;;  %v1727_v54 = vadd.s32 %v593_v49, %v584_v44 }
  0xd8   :  { %v517_v20 = vxor.u32 2147483648, %v511_v39  ;;  %v521_v46 = vsel %vm519_vm0, %v520_v55, %v511_v39  ;;  %v1142_v21 = vsel %vm1140_vm1, %v520_v55, %v511_v39  ;;  %v185_v59 = vsel %vm1684_vm4, %v1410_v9, %v182_v4 }
  0xd9   :  { %v612_v60 = vsel %vm611_vm13, 1, %v1374_v0  ;;  %v187_v29 = vmul.f32 %v185_v59, %v185_v59  ;;  %v606_v26 = vshrl.u32 %v601_v10, 16  ;;  %v1735_v8 = vadd.s32 %v609_v43, %v605_v35 }
  0xda   :  { %v518_v41 = vsel %vm516_vm2, %v503_v32, %v517_v20  ;;  %v1139_v47 = vsel %vm1137_vm3, %v503_v32, %v517_v20  ;;  %v614_v57 = vadd.s32 %v612_v60, %v610_v50  ;;  %v217_v1 = vand.u32 2139095040, %v1657_v34 }
  0xdb   :  { %v522_v58 = vsel %vm515_vm6, %v518_v41, %v521_v46  ;;  %v1143_v61 = vsel %vm1136_vm7, %v1139_v47, %v1142_v21  ;;  %v188_v15 = vmul.f32 -0.001358992, %v187_v29  ;;  %v195_v11 = vmul.f32 -0.00019511016, %v187_v29 }
  0xdc   :  { %v523_v62 = vsel %vm512_vm8, nan, %v522_v58  ;;  %v1144_v52 = vsel %vm512_vm8, nan, %v1143_v61  ;;  %v615_v24 = vadd.s32 %v614_v57, %v604_v53  ;;  %v563_v5 = vsel %vm557_vm14, %v1661_v37, %v562_v63 }
  0xdd   :  { %681 = vst [vmem:[%s1869_s2 + $0x10] sm:$0xff] %v523_v62  ;;  %v189_v2 = vadd.f32 0.041655596, %v188_v15  ;;  %v196_v22 = vadd.f32 0.008332121, %v195_v11  ;;  %v186_v10 = vsel %vm1684_vm4, 0, %v1652_v27  ;;  %vm619_vm9 = vc.u32 %v1727_v54, %v1735_v8 }
  0xde   :  { %1301 = vst [vmem:[%s1869_s2 + $0x30] sm:$0xff] %v1144_v52  ;;  %v616_v3 = vadd.s32 %v615_v24, %v606_v26  ;;  %v218_v12 = vshrl.u32 %v217_v1, 23  ;;  %v617_v14 = vmul.u32 %v1591_v23, %v563_v5  ;;  %v203_v18 = vadd.s32 3, %v186_v10 }
  0xdf   :  { %v190_v6 = vmul.f32 %v189_v2, %v187_v29  ;;  %v197_v13 = vmul.f32 %v196_v22, %v187_v29  ;;  %v827_v33 = vand.u32 3, %v186_v10  ;;  %v214_v23 = vand.u32 2147483647, %v1657_v34 }
  0xe0   :  { %v620_v32 = vadd.s32 1, %v616_v3  ;;  %v1311_v40 = vadd.s32 4294967169, %v218_v12  ;;  %v204_v16 = vand.u32 3, %v203_v18  ;;  %vm202_vm14 = vweird.f32 %v1410_v9 }
  0xe1   :  { %v191_v7 = vadd.f32 -0.4999988, %v190_v6  ;;  %v198_v17 = vadd.f32 -0.16666654, %v197_v13  ;;  %vm828_vm15 = vcmp.lt.s32.totalorder %v827_v33, 2  ;;  %vm829_vm0 = vcmp.eq.s32.totalorder %v827_v33, 0 }
  0xe2   :  { %v621_v28 = vsel %vm619_vm9, %v620_v32, %v616_v3  ;;  %v224_v56 = vadd.s32 1, %v1311_v40  ;;  %vm205_vm1 = vcmp.lt.s32.totalorder %v204_v16, 2  ;;  %vm832_vm2 = vcmp.eq.s32.totalorder %v827_v33, 2 }
  0xe3   :  { %v622_v37 = vadd.s32 %v621_v28, %v617_v14  ;;  %v192_v31 = vmul.f32 %v191_v7, %v187_v29  ;;  %v199_v39 = vmul.f32 %v198_v17, %v187_v29  ;;  %vm206_vm3 = vcmp.eq.s32.totalorder %v204_v16, 0 }
  0xe4   :  { %vm225_vm12 = vcmp.gt.s32.totalorder %v224_v56, 0  ;;  %vm209_vm4 = vcmp.eq.s32.totalorder %v204_v16, 2  ;;  %v221_v4 = vand.u32 8388607, %v214_v23  ;;  %v618_v14 = vadd.s32 %v1735_v8, %v1727_v54 }
  0xe5   :  { %v623_v27 = vadd.s32 536870912, %v622_v37  ;;  %v193_v55 = vadd.f32 1.0, %v192_v31  ;;  %v200_v43 = vadd.f32 1.0, %v199_v39  ;;  %v226_v44 = vsel %vm225_vm12, %v224_v56, 0 }
  0xe6   :  { %v228_v19 = vand.u32 31, %v226_v44  ;;  %v222_v26 = vor.u32 8388608, %v221_v4  ;;  %v1771_v24 = vshrl.u32 %v226_v44, 5  ;;  %vm1816_vm13 = vcmp.le.f32.partialorder %v524_v25, 0.7853982 }
  0xe7   :  { %v1747_v35 = vshrl.u32 %v623_v27, 30  ;;  %v201_v20 = vmul.f32 %v200_v43, %v185_v59  ;;  %v210_v49 = vxor.u32 2147483648, %v193_v55  ;;  %vm526_vm9 = vcmp.lt.s32.totalorder %v1425_v30, 0 }
  0xe8   :  { %v1752_v46 = vsub.s32 32, %v228_v19  ;;  %v231_v9 = vshll.u32 %v1375_v36, %v228_v19  ;;  %v234_v1 = vshll.u32 %v1376_v38, %v228_v19  ;;  %v240_v22 = vshll.u32 %v1378_v45, %v228_v19 }
  0xe9   :  { %v625_v53 = vshll.u32 %v1747_v35, 30  ;;  %v207_v50 = vxor.u32 2147483648, %v201_v20  ;;  %v211_v47 = vsel %vm209_vm4, %v210_v49, %v201_v20  ;;  %v834_v60 = vsel %vm832_vm2, %v210_v49, %v201_v20 }
  0xea   :  { %v232_v52 = vshrl.u32 %v1376_v38, %v1752_v46  ;;  %v235_v15 = vshrl.u32 %v1377_v42, %v1752_v46  ;;  %v238_v2 = vshrl.u32 %v1378_v45, %v1752_v46  ;;  %v241_v5 = vshrl.u32 %v1379_v48, %v1752_v46 }
  0xeb   :  { %v626_v21 = vsub.s32 %v622_v37, %v625_v53  ;;  %v208_v41 = vsel %vm206_vm3, %v193_v55, %v207_v50  ;;  %v831_v59 = vsel %vm829_vm0, %v193_v55, %v207_v50  ;;  %v237_v12 = vshll.u32 %v1377_v42, %v228_v19 }
  0xec   :  { %v212_v58 = vsel %vm205_vm1, %v208_v41, %v211_v47  ;;  %v835_v61 = vsel %vm828_vm15, %v831_v59, %v834_v60  ;;  %v233_v10 = vor.u32 %v232_v52, %v231_v9  ;;  %v1781_v6 = vor.u32 %v235_v15, %v234_v1 }
  0xed   :  { %vm627_vm5 = vcmp.lt.s32.totalorder %v626_v21, 0  ;;  %v628_v29 = vsub.s32 0, %v626_v21  ;;  %v213_v57 = vsel %vm202_vm14, nan, %v212_v58  ;;  %v836_v62 = vsel %vm202_vm14, nan, %v835_v61 }
  0xee   :  { %679 = vst [vmem:[%s1869_s2] sm:$0xff] %v213_v57  ;;  %v242_v13 = vor.u32 %v241_v5, %v240_v22  ;;  %v243_v32 = vshll.u32 %v1379_v48, %v228_v19  ;;  %v244_v38 = vshrl.u32 %v1380_v51, %v1752_v46  ;;  %v239_v45 = vor.u32 %v238_v2, %v237_v12 }
  0xef   :  { %v629_v63 = vsel %vm627_vm5, %v628_v29, %v626_v21  ;;  %1299 = vst [vmem:[%s1869_s2 + $0x20] sm:$0xff] %v836_v62  ;;  %vm246_vm7 = vcmp.lt.s32.totalorder %v1771_v24, 1  ;;  %v1789_v17 = vshll.u32 %v222_v26, 8  ;;  %vm247_vm8 = vcmp.lt.s32.totalorder %v1771_v24, 2 }
  0xf0   :  { %v630_v11 = vclz %v629_v63  ;;  %v245_v7 = vor.u32 %v244_v38, %v243_v32  ;;  %vm249_vm10 = vcmp.lt.s32.totalorder %v1771_v24, 4  ;;  %vm248_vm11 = vcmp.lt.s32.totalorder %v1771_v24, 3 }
  0xf1   :  { %v254_v51 = vsel %vm246_vm7, %v233_v10, %v1781_v6  ;;  %v255_v54 = vsel %vm249_vm10, %v242_v13, 920167782  ;;  %v258_v56 = vsel %vm246_vm7, %v1781_v6, %v239_v45  ;;  %v263_v44 = vand.u32 65535, %v1789_v17 }
  0xf2   :  { %v1318_v3 = vadd.s32 4294967294, %v630_v11  ;;  %v256_v37 = vsel %vm248_vm11, %v239_v45, %v255_v54  ;;  %v259_v39 = vsel %vm249_vm10, %v245_v7, 1326507024  ;;  %v264_v19 = vshrl.u32 %v1789_v17, 16 }
  0xf3   :  { %v257_v31 = vsel %vm247_vm8, %v254_v51, %v256_v37  ;;  %v260_v55 = vsel %vm248_vm11, %v242_v13, %v259_v39  ;;  %v648_v4 = vsub.s32 4, %v1747_v35  ;;  %v230_v41 = vshrl.u32 %v1375_v36, %v1752_v46 }
  0xf4   :  { %vm1319_vm6 = vcmp.lt.s32.totalorder %v1318_v3, 0  ;;  %v287_v43 = vand.u32 65535, %v257_v31  ;;  %v261_v16 = vsel %vm247_vm8, %v258_v56, %v260_v55  ;;  %v288_v20 = vshrl.u32 %v257_v31, 16 }
  0xf5   :  { %v633_v40 = vsel %vm1319_vm6, 0, %v1318_v3  ;;  %v265_v50 = vand.u32 65535, %v261_v16  ;;  %v250_v25 = vsel %vm246_vm7, %v230_v41, %v233_v10  ;;  %v251_v5 = vsel %vm249_vm10, %v239_v45, 2102212464 }
  0xf6   :  { %v634_v42 = vsub.s32 32, %v633_v40  ;;  %v638_v18 = vsub.s32 4294967266, %v633_v40  ;;  %v635_v48 = vshll.u32 %v626_v21, %v633_v40  ;;  %v266_v21 = vshrl.u32 %v261_v16, 16 }
  0xf7   :  { %v290_v47 = vmul.u32 %v288_v20, %v263_v44  ;;  %v291_v59 = vmul.u32 %v287_v43, %v264_v19  ;;  %v269_v29 = vmul.u32 %v265_v50, %v264_v19  ;;  %v289_v57 = vmul.u32 %v287_v43, %v263_v44 }
  0xf8   :  { %v636_v8 = vshrl.u32 %v618_v14, %v634_v42  ;;  %v639_v28 = vadd.s32 127, %v638_v18  ;;  %v268_v61 = vmul.u32 %v266_v21, %v263_v44  ;;  %v292_v62 = vmul.u32 %v288_v20, %v264_v19 }
  0xf9   :  { %v293_v52 = vshll.u32 %v290_v47, 16  ;;  %v267_v15 = vmul.u32 %v265_v50, %v263_v44  ;;  %v270_v11 = vmul.u32 %v266_v21, %v264_v19  ;;  %v273_v9 = vshll.u32 %v269_v29, 16 }
  0xfa   :  { %v637_v33 = vor.u32 %v636_v8, %v635_v48  ;;  %v640_v27 = vshll.u32 %v639_v28, 23  ;;  %v271_v26 = vshll.u32 %v268_v61, 16  ;;  %v295_v1 = vshll.u32 %v291_v59, 16 }
  0xfb   :  { %vm297_vm12 = vc.u32 %v289_v57, %v293_v52  ;;  %v299_v36 = vadd.s32 %v293_v52, %v289_v57  ;;  %v294_v40 = vshrl.u32 %v290_v47, 16  ;;  %v252_v42 = vsel %vm248_vm11, %v1781_v6, %v251_v5 }
  0xfc   :  { %v641_v53 = vor.u32 4788187, %v640_v27  ;;  %v644_v58 = vcvt.s32.f32 %v637_v33  ;;  %vm275_vm14 = vc.u32 %v267_v15, %v271_v26  ;;  %v277_v2 = vadd.s32 %v271_v26, %v267_v15 }
  0xfd   :  { %v298_v22 = vsel %vm297_vm12, 1, %v1374_v0  ;;  %v276_v3 = vsel %vm275_vm14, 1, %v1374_v0  ;;  %vm301_vm15 = vc.u32 %v299_v36, %v295_v1  ;;  %v272_v18 = vshrl.u32 %v268_v61, 16 }
  0xfe   :  { %v642_v60 = vand.u32 2147483647, %v641_v53  ;;  %v300_v10 = vadd.s32 %v298_v22, %v292_v62  ;;  %v278_v13 = vadd.s32 %v276_v3, %v270_v11  ;;  %vm279_vm0 = vc.u32 %v277_v2, %v273_v9 }
  0xff   :  { %v302_v32 = vsel %vm301_vm15, 1, %v1374_v0  ;;  %v280_v14 = vsel %vm279_vm0, 1, %v1374_v0  ;;  %v649_v51 = vsel %vm526_vm9, %v648_v4, %v1747_v35  ;;  %v296_v54 = vshrl.u32 %v291_v59, 16 }
 0x100   :  { %v645_v63 = vmul.f32 %v644_v58, %v642_v60  ;;  %v304_v7 = vadd.s32 %v302_v32, %v300_v10  ;;  %v282_v48 = vadd.s32 %v280_v14, %v278_v13  ;;  %v274_v56 = vshrl.u32 %v269_v29, 16 }
 0x101   :  { %v253_v0 = vsel %vm247_vm8, %v250_v25, %v252_v42  ;;  %v303_v6 = vadd.s32 %v299_v36, %v295_v1  ;;  %v651_v43 = vsel %vm1816_vm13, 0, %v649_v51  ;;  %vm667_vm10 = vweird.f32 %v1425_v30 }
 0x102   :  { %v646_v46 = vxor.u32 2147483648, %v645_v63  ;;  %v305_v8 = vadd.s32 %v304_v7, %v294_v40  ;;  %v283_v31 = vadd.s32 %v282_v48, %v272_v18  ;;  %v307_v19 = vmul.u32 %v1789_v17, %v253_v0 }
 0x103   :  { %v668_v21 = vadd.s32 3, %v651_v43  ;;  %v1289_v59 = vand.u32 3, %v651_v43 }
 0x104   :  { %v647_v12 = vsel %vm526_vm9, %v646_v46, %v645_v63  ;;  %v306_v39 = vadd.s32 %v305_v8, %v296_v54  ;;  %v284_v55 = vadd.s32 %v283_v31, %v274_v56  ;;  %vm215_vm9 = vcmp.le.f32.partialorder %v214_v23, 0.7853982 }
 0x105   :  { %v650_v38 = vsel %vm1816_vm13, %v1425_v30, %v647_v12  ;;  %v669_v61 = vand.u32 3, %v668_v21  ;;  %vm1290_vm2 = vcmp.lt.s32.totalorder %v1289_v59, 2  ;;  %vm1291_vm3 = vcmp.eq.s32.totalorder %v1289_v59, 0 }
 0x106   :  { %v652_v45 = vmul.f32 %v650_v38, %v650_v38  ;;  %v310_v16 = vadd.s32 1, %v306_v39  ;;  %vm309_vm1 = vc.u32 %v284_v55, %v303_v6  ;;  %vm1294_vm5 = vcmp.eq.s32.totalorder %v1289_v59, 2 }
 0x107   :  { %vm674_vm4 = vcmp.eq.s32.totalorder %v669_v61, 2  ;;  %vm670_vm6 = vcmp.lt.s32.totalorder %v669_v61, 2  ;;  %vm671_vm7 = vcmp.eq.s32.totalorder %v669_v61, 0  ;;  %v308_v10 = vadd.s32 %v303_v6, %v284_v55 }
 0x108   :  { %v653_v28 = vmul.f32 -0.001358992, %v652_v45  ;;  %v660_v37 = vmul.f32 -0.00019511016, %v652_v45  ;;  %v311_v20 = vsel %vm309_vm1, %v310_v16, %v306_v39  ;;  %vm216_vm13 = vcmp.lt.s32.totalorder %v1657_v34, 0 }
 0x109   :  { %v312_v24 = vadd.s32 %v311_v20, %v307_v19 }
 0x10a   :  { %v654_v33 = vadd.f32 0.041655596, %v653_v28  ;;  %v661_v27 = vadd.f32 0.008332121, %v660_v37 }
 0x10b   :  { %v313_v47 = vadd.s32 536870912, %v312_v24 }
 0x10c   :  { %v655_v44 = vmul.f32 %v654_v33, %v652_v45  ;;  %v662_v35 = vmul.f32 %v661_v27, %v652_v45 }
 0x10d   :  { %v314_v49 = vshrl.u32 %v313_v47, 30 }
 0x10e   :  { %v656_v53 = vadd.f32 -0.4999988, %v655_v44  ;;  %v663_v50 = vadd.f32 -0.16666654, %v662_v35 }
 0x10f   :  { %v315_v57 = vshll.u32 %v314_v49, 30  ;;  %v338_v54 = vsub.s32 4, %v314_v49 }
 0x110   :  { %v657_v4 = vmul.f32 %v656_v53, %v652_v45  ;;  %v664_v41 = vmul.f32 %v663_v50, %v652_v45 }
 0x111   :  { %v316_v62 = vsub.s32 %v312_v24, %v315_v57  ;;  %v339_v31 = vsel %vm216_vm13, %v338_v54, %v314_v49 }
 0x112   :  { %v658_v60 = vadd.f32 1.0, %v657_v4  ;;  %v665_v58 = vadd.f32 1.0, %v664_v41  ;;  %v341_v33 = vsel %vm215_vm9, 0, %v339_v31 }
 0x113   :  { %vm317_vm8 = vcmp.lt.s32.totalorder %v316_v62, 0  ;;  %v318_v26 = vsub.s32 0, %v316_v62  ;;  %v358_v16 = vadd.s32 3, %v341_v33  ;;  %v981_v20 = vand.u32 3, %v341_v33 }
 0x114   :  { %v666_v29 = vmul.f32 %v665_v58, %v650_v38  ;;  %v675_v25 = vxor.u32 2147483648, %v658_v60 }
 0x115   :  { %v319_v2 = vsel %vm317_vm8, %v318_v26, %v316_v62  ;;  %v359_v53 = vand.u32 3, %v358_v16  ;;  %vm982_vm12 = vcmp.lt.s32.totalorder %v981_v20, 2  ;;  %vm983_vm14 = vcmp.eq.s32.totalorder %v981_v20, 0 }
 0x116   :  { %v672_v17 = vxor.u32 2147483648, %v666_v29  ;;  %v676_v52 = vsel %vm674_vm4, %v675_v25, %v666_v29  ;;  %v1296_v63 = vsel %vm1294_vm5, %v675_v25, %v666_v29  ;;  %v320_v22 = vclz %v319_v2 }
 0x117   :  { %vm360_vm15 = vcmp.lt.s32.totalorder %v359_v53, 2  ;;  %vm361_vm0 = vcmp.eq.s32.totalorder %v359_v53, 0  ;;  %vm364_vm1 = vcmp.eq.s32.totalorder %v359_v53, 2 }
 0x118   :  { %v673_v15 = vsel %vm671_vm7, %v658_v60, %v672_v17  ;;  %v1293_v11 = vsel %vm1291_vm3, %v658_v60, %v672_v17  ;;  %v1312_v5 = vadd.s32 4294967294, %v320_v22  ;;  %vm357_vm3 = vweird.f32 %v1657_v34 }
 0x119   :  { %v677_v9 = vsel %vm670_vm6, %v673_v15, %v676_v52  ;;  %v1297_v1 = vsel %vm1290_vm2, %v1293_v11, %v1296_v63  ;;  %vm986_vm2 = vcmp.eq.s32.totalorder %v981_v20, 2 }
 0x11a   :  { %v678_v36 = vsel %vm667_vm10, nan, %v677_v9  ;;  %v1298_v46 = vsel %vm667_vm10, nan, %v1297_v1  ;;  %vm1313_vm11 = vcmp.lt.s32.totalorder %v1312_v5, 0 }
 0x11b   :  { %682 = vst [vmem:[%s1869_s2 + $0x18] sm:$0xff] %v678_v36  ;;  %v323_v3 = vsel %vm1313_vm11, 0, %v1312_v5 }
 0x11c   :  { %1302 = vst [vmem:[%s1869_s2 + $0x38] sm:$0xff] %v1298_v46  ;;  %v324_v30 = vsub.s32 32, %v323_v3  ;;  %v328_v12 = vsub.s32 4294967266, %v323_v3  ;;  %v325_v13 = vshll.u32 %v316_v62, %v323_v3 }
 0x11e   :  { %v326_v32 = vshrl.u32 %v308_v10, %v324_v30  ;;  %v329_v38 = vadd.s32 127, %v328_v12 }
 0x120   :  { %v327_v14 = vor.u32 %v326_v32, %v325_v13  ;;  %v330_v40 = vshll.u32 %v329_v38, 23 }
 0x122   :  { %v331_v7 = vor.u32 4788187, %v330_v40  ;;  %v334_v42 = vcvt.s32.f32 %v327_v14 }
 0x124   :  { %v332_v45 = vand.u32 2147483647, %v331_v7 }
 0x126   :  { %v335_v18 = vmul.f32 %v334_v42, %v332_v45 }
 0x128   :  { %v336_v48 = vxor.u32 2147483648, %v335_v18 }
 0x12a   :  { %v337_v51 = vsel %vm216_vm13, %v336_v48, %v335_v18 }
 0x12b   :  { %v340_v8 = vsel %vm215_vm9, %v1657_v34, %v337_v51 }
 0x12c   :  { %v342_v28 = vmul.f32 %v340_v8, %v340_v8 }
 0x12e   :  { %v343_v37 = vmul.f32 -0.001358992, %v342_v28  ;;  %v350_v56 = vmul.f32 -0.00019511016, %v342_v28 }
 0x130   :  { %v344_v0 = vadd.f32 0.041655596, %v343_v37  ;;  %v351_v39 = vadd.f32 0.008332121, %v350_v56 }
 0x132   :  { %v345_v27 = vmul.f32 %v344_v0, %v342_v28  ;;  %v352_v55 = vmul.f32 %v351_v39, %v342_v28 }
 0x134   :  { %v346_v6 = vadd.f32 -0.4999988, %v345_v27  ;;  %v353_v43 = vadd.f32 -0.16666654, %v352_v55 }
 0x136   :  { %v347_v44 = vmul.f32 %v346_v6, %v342_v28  ;;  %v354_v35 = vmul.f32 %v353_v43, %v342_v28 }
 0x138   :  { %v348_v19 = vadd.f32 1.0, %v347_v44  ;;  %v355_v23 = vadd.f32 1.0, %v354_v35 }
 0x13a   :  { %v356_v50 = vmul.f32 %v355_v23, %v340_v8  ;;  %v365_v21 = vxor.u32 2147483648, %v348_v19 }
 0x13c   :  { %v362_v24 = vxor.u32 2147483648, %v356_v50  ;;  %v366_v41 = vsel %vm364_vm1, %v365_v21, %v356_v50  ;;  %v988_v59 = vsel %vm986_vm2, %v365_v21, %v356_v50 }
 0x13e   :  { %v363_v4 = vsel %vm361_vm0, %v348_v19, %v362_v24  ;;  %v985_v47 = vsel %vm983_vm14, %v348_v19, %v362_v24 }
 0x13f   :  { %v367_v60 = vsel %vm360_vm15, %v363_v4, %v366_v41  ;;  %v989_v58 = vsel %vm982_vm12, %v985_v47, %v988_v59 }
 0x140   :  { %v368_v61 = vsel %vm357_vm3, nan, %v367_v60  ;;  %v990_v49 = vsel %vm357_vm3, nan, %v989_v58 }
 0x141   :  { %680 = vst [vmem:[%s1869_s2 + $0x8] sm:$0xff] %v368_v61 }
 0x142   :  { %1300 = vst [vmem:[%s1869_s2 + $0x28] sm:$0xff] %v990_v49 }
 0x143   :  { %1307 = vsyncpa [#allocation3], 1 }

</bundles_post_ra>
